<compile_context>
chip_gen: v7x
topology: tpu7x:2x2x1
jax: 0.10.0
libtpu: 0.0.40
codegen_flags: <defaults>
</compile_context>

<pallas_src>
import jax
import jax.numpy as jnp
from jax.experimental import pallas as pl
from jax.experimental.pallas import tpu as pltpu

# ---- model hyper-parameters (small, consistent with the module's __init__) ----
IN_DIM = 16
OUT_DIM = 16
HIDDEN_DIM = 32
NUM_LAYERS = 2
NEG_SLOPE = 0.01  # F.leaky_relu default


def _leaky_relu(x):
    return jnp.where(x >= 0, x, NEG_SLOPE * x)


def conditioner_kernel(x_ref, w_in_ref, b_in_ref, w_h_ref, b_h_ref,
                       w_a_ref, b_a_ref, w_b_ref, b_b_ref, a_ref, b_ref):
    # Batch-major: every activation is (batch_tile, features).
    # input layer: (bt, in) @ (in, hidden) + (1, hidden)
    h = jnp.dot(x_ref[...], w_in_ref[...],
                preferred_element_type=jnp.float32) + b_in_ref[...]
    h = _leaky_relu(h)

    # hidden layers (static Python loop -> unrolled in the traced body)
    for l in range(NUM_LAYERS):
        h = jnp.dot(h, w_h_ref[l],
                    preferred_element_type=jnp.float32) + b_h_ref[l]
        h = _leaky_relu(h)

    # output layer, pre-chunked: two (bt, hidden) @ (hidden, out) matmuls,
    # written straight to the two outputs (fuses torch.chunk(2, dim=-1)).
    a_ref[...] = (jnp.dot(h, w_a_ref[...], preferred_element_type=jnp.float32)
                  + b_a_ref[...]).astype(a_ref.dtype)
    b_ref[...] = (jnp.dot(h, w_b_ref[...], preferred_element_type=jnp.float32)
                  + b_b_ref[...]).astype(b_ref.dtype)


def _pick_block_batch(batch):
    """Largest sublane-friendly batch tile that divides `batch` with grid >= 2."""
    for cand in (2048, 1024, 512, 256, 128):
        if batch % cand == 0 and batch // cand >= 2:
            return cand
    # small / awkward batch: one tile covering everything (full-dim block is
    # exempt from the (8, 128) divisibility requirement)
    return batch


def conditioner_forward(x, params, *, block_batch=None):
    """Run the fused Conditioner MLP. Returns (a, b), each (batch, OUT_DIM)."""
    w_in, b_in, w_h, b_h, w_out, b_out = params  # PyTorch Linear layout (out, in)
    batch = x.shape[0]
    if block_batch is None:
        block_batch = _pick_block_batch(batch)
    assert batch % block_batch == 0
    assert block_batch == batch or block_batch % 128 == 0
    grid = (batch // block_batch,)

    # Pre-transpose / split the tiny (<20 KB) parameters once in the wrapper so
    # every in-kernel matmul is a straight A[M,K] @ B[K,N].
    w_in_t = w_in.T                               # (IN_DIM, HIDDEN)
    b_in_r = b_in.reshape(1, HIDDEN_DIM)
    w_h_t = jnp.transpose(w_h, (0, 2, 1))         # (L, HIDDEN, HIDDEN)
    b_h_r = b_h.reshape(NUM_LAYERS, 1, HIDDEN_DIM)
    w_out_t = w_out.T                             # (HIDDEN, 2*OUT)
    w_a = w_out_t[:, :OUT_DIM]
    w_b = w_out_t[:, OUT_DIM:]
    b_a = b_out[:OUT_DIM].reshape(1, OUT_DIM)
    b_b = b_out[OUT_DIM:].reshape(1, OUT_DIM)

    const = lambda i: (0, 0)        # grid-invariant weights / biases
    const3 = lambda i: (0, 0, 0)

    a, b = pl.pallas_call(
        conditioner_kernel,
        out_shape=(jax.ShapeDtypeStruct((batch, OUT_DIM), x.dtype),
                   jax.ShapeDtypeStruct((batch, OUT_DIM), x.dtype)),
        grid_spec=pl.GridSpec(
            grid=grid,
            in_specs=[
                # x: tiled over batch (leading / sublane axis)
                pl.BlockSpec((block_batch, IN_DIM), lambda i: (i, 0)),
                # weights / biases: full arrays, grid-invariant
                pl.BlockSpec((IN_DIM, HIDDEN_DIM), const),
                pl.BlockSpec((1, HIDDEN_DIM), const),
                pl.BlockSpec((NUM_LAYERS, HIDDEN_DIM, HIDDEN_DIM), const3),
                pl.BlockSpec((NUM_LAYERS, 1, HIDDEN_DIM), const3),
                pl.BlockSpec((HIDDEN_DIM, OUT_DIM), const),
                pl.BlockSpec((1, OUT_DIM), const),
                pl.BlockSpec((HIDDEN_DIM, OUT_DIM), const),
                pl.BlockSpec((1, OUT_DIM), const),
            ],
            out_specs=(pl.BlockSpec((block_batch, OUT_DIM), lambda i: (i, 0)),
                       pl.BlockSpec((block_batch, OUT_DIM), lambda i: (i, 0))),
        ),
        compiler_params=pltpu.CompilerParams(
            dimension_semantics=("parallel",)),
    )(x, w_in_t, b_in_r, w_h_t, b_h_r, w_a, b_a, w_b, b_b)

    return a, b


def init_params(key):
    """Deterministic synthetic parameters in PyTorch Linear layout (out, in)."""
    ks = jax.random.split(key, 6)
    scale_in = 1.0 / jnp.sqrt(IN_DIM)
    scale_h = 1.0 / jnp.sqrt(HIDDEN_DIM)
    w_in = jax.random.uniform(ks[0], (HIDDEN_DIM, IN_DIM), jnp.float32,
                              -scale_in, scale_in)
    b_in = jax.random.uniform(ks[1], (HIDDEN_DIM,), jnp.float32,
                              -scale_in, scale_in)
    w_h = jax.random.uniform(ks[2], (NUM_LAYERS, HIDDEN_DIM, HIDDEN_DIM),
                             jnp.float32, -scale_h, scale_h)
    b_h = jax.random.uniform(ks[3], (NUM_LAYERS, HIDDEN_DIM), jnp.float32,
                             -scale_h, scale_h)
    w_out = jax.random.uniform(ks[4], (2 * OUT_DIM, HIDDEN_DIM), jnp.float32,
                               -scale_h, scale_h)
    b_out = jax.random.uniform(ks[5], (2 * OUT_DIM,), jnp.float32,
                               -scale_h, scale_h)
    return (w_in, b_in, w_h, b_h, w_out, b_out)


def reference_forward(x, params):
    """Pure-JAX reference mirroring the PyTorch module."""
    w_in, b_in, w_h, b_h, w_out, b_out = params
    h = _leaky_relu(x @ w_in.T + b_in)
    for l in range(NUM_LAYERS):
        h = _leaky_relu(h @ w_h[l].T + b_h[l])
    y = h @ w_out.T + b_out
    return y[:, :OUT_DIM], y[:, OUT_DIM:]


if __name__ == "__main__":
    key = jax.random.PRNGKey(0)
    kx, kp = jax.random.split(key)
    batch = 256  # auto-tiled to block_batch=128 -> grid=(2,) (both TCs on v7x)
    x = jax.random.normal(kx, (batch, IN_DIM), jnp.float32)
    params = init_params(kp)

    a, b = conditioner_forward(x, params)
    a = jax.block_until_ready(a)
    b = jax.block_until_ready(b)

    a_ref, b_ref = reference_forward(x, params)
    assert a.shape == (batch, OUT_DIM) and b.shape == (batch, OUT_DIM)
    assert jnp.allclose(a, a_ref, atol=1e-4, rtol=1e-4)
    assert jnp.allclose(b, b_ref, atol=1e-4, rtol=1e-4)

    print("KERNEL_OK")
</pallas_src>

<mosaic_0001>
module attributes {stable_mosaic.version = 11 : i64} {
  func.func @conditioner_kernel(%arg0: i32, %arg1: memref<128x16xf32, #tpu.memory_space<vmem>>, %arg2: memref<16x32xf32, #tpu.memory_space<vmem>>, %arg3: memref<1x32xf32, #tpu.memory_space<vmem>>, %arg4: memref<2x32x32xf32, #tpu.memory_space<vmem>>, %arg5: memref<2x1x32xf32, #tpu.memory_space<vmem>>, %arg6: memref<32x16xf32, #tpu.memory_space<vmem>>, %arg7: memref<1x16xf32, #tpu.memory_space<vmem>>, %arg8: memref<32x16xf32, #tpu.memory_space<vmem>>, %arg9: memref<1x16xf32, #tpu.memory_space<vmem>>, %arg10: memref<128x16xf32, #tpu.memory_space<vmem>>, %arg11: memref<128x16xf32, #tpu.memory_space<vmem>>) attributes {dimension_semantics = [#tpu.dimension_semantics<parallel>], iteration_bounds = array<i64: 2>, scalar_prefetch = 0 : i64, scratch_operands = 0 : i64, tpu.core_type = #tpu.core_type<tc>, window_params = [{transform_indices = @transform_0, window_bounds = array<i64: 128, 16>}, {pipeline_mode = #tpu.pipeline_mode<synchronous>, transform_indices = @transform_1, window_bounds = array<i64: 16, 32>}, {pipeline_mode = #tpu.pipeline_mode<synchronous>, transform_indices = @transform_2, window_bounds = array<i64: 1, 32>}, {pipeline_mode = #tpu.pipeline_mode<synchronous>, transform_indices = @transform_3, window_bounds = array<i64: 2, 32, 32>}, {pipeline_mode = #tpu.pipeline_mode<synchronous>, transform_indices = @transform_4, window_bounds = array<i64: 2, 1, 32>}, {pipeline_mode = #tpu.pipeline_mode<synchronous>, transform_indices = @transform_5, window_bounds = array<i64: 32, 16>}, {pipeline_mode = #tpu.pipeline_mode<synchronous>, transform_indices = @transform_6, window_bounds = array<i64: 1, 16>}, {pipeline_mode = #tpu.pipeline_mode<synchronous>, transform_indices = @transform_7, window_bounds = array<i64: 32, 16>}, {pipeline_mode = #tpu.pipeline_mode<synchronous>, transform_indices = @transform_8, window_bounds = array<i64: 1, 16>}, {transform_indices = @transform_9, window_bounds = array<i64: 128, 16>}, {transform_indices = @transform_10, window_bounds = array<i64: 128, 16>}]} {
    %c0 = arith.constant 0 : index
    %c0_0 = arith.constant 0 : index
    %0 = vector.load %arg1[%c0, %c0_0] : memref<128x16xf32, #tpu.memory_space<vmem>>, vector<128x16xf32>
    %c0_1 = arith.constant 0 : index
    %c0_2 = arith.constant 0 : index
    %1 = vector.load %arg2[%c0_1, %c0_2] : memref<16x32xf32, #tpu.memory_space<vmem>>, vector<16x32xf32>
    %cst = arith.constant dense<0.000000e+00> : vector<128x32xf32>
    %2 = tpu.matmul %0, %1, %cst {dimension_numbers = #tpu.dot_dimension_numbers<[1], [0], [0], [1], [0, 0, 1, 1], [], []>} : vector<128x16xf32>, vector<16x32xf32>, vector<128x32xf32> -> vector<128x32xf32>
    %c0_3 = arith.constant 0 : index
    %c0_4 = arith.constant 0 : index
    %3 = vector.load %arg3[%c0_3, %c0_4] : memref<1x32xf32, #tpu.memory_space<vmem>>, vector<1x32xf32>
    %4 = vector.broadcast %3 : vector<1x32xf32> to vector<128x32xf32>
    %5 = arith.addf %2, %4 : vector<128x32xf32>
    %cst_5 = arith.constant 0.000000e+00 : f32
    %6 = vector.broadcast %cst_5 : f32 to vector<128x32xf32>
    %7 = arith.cmpf oge, %5, %6 : vector<128x32xf32>
    %cst_6 = arith.constant 0.00999999977 : f32
    %8 = vector.broadcast %cst_6 : f32 to vector<128x32xf32>
    %9 = arith.mulf %8, %5 : vector<128x32xf32>
    %10 = arith.select %7, %5, %9 : vector<128x32xi1>, vector<128x32xf32>
    %c0_7 = arith.constant 0 : index
    %c0_8 = arith.constant 0 : index
    %c0_9 = arith.constant 0 : index
    %11 = vector.load %arg4[%c0_7, %c0_8, %c0_9] : memref<2x32x32xf32, #tpu.memory_space<vmem>>, vector<1x32x32xf32>
    %12 = vector.shape_cast %11 : vector<1x32x32xf32> to vector<32x32xf32>
    %cst_10 = arith.constant dense<0.000000e+00> : vector<128x32xf32>
    %13 = tpu.matmul %10, %12, %cst_10 {dimension_numbers = #tpu.dot_dimension_numbers<[1], [0], [0], [1], [0, 0, 1, 1], [], []>} : vector<128x32xf32>, vector<32x32xf32>, vector<128x32xf32> -> vector<128x32xf32>
    %c0_11 = arith.constant 0 : index
    %c0_12 = arith.constant 0 : index
    %c0_13 = arith.constant 0 : index
    %14 = vector.load %arg5[%c0_11, %c0_12, %c0_13] : memref<2x1x32xf32, #tpu.memory_space<vmem>>, vector<1x1x32xf32>
    %15 = vector.shape_cast %14 : vector<1x1x32xf32> to vector<1x32xf32>
    %16 = vector.broadcast %15 : vector<1x32xf32> to vector<128x32xf32>
    %17 = arith.addf %13, %16 : vector<128x32xf32>
    %cst_14 = arith.constant 0.000000e+00 : f32
    %18 = vector.broadcast %cst_14 : f32 to vector<128x32xf32>
    %19 = arith.cmpf oge, %17, %18 : vector<128x32xf32>
    %cst_15 = arith.constant 0.00999999977 : f32
    %20 = vector.broadcast %cst_15 : f32 to vector<128x32xf32>
    %21 = arith.mulf %20, %17 : vector<128x32xf32>
    %22 = arith.select %19, %17, %21 : vector<128x32xi1>, vector<128x32xf32>
    %c1 = arith.constant 1 : index
    %c0_16 = arith.constant 0 : index
    %c0_17 = arith.constant 0 : index
    %23 = vector.load %arg4[%c1, %c0_16, %c0_17] : memref<2x32x32xf32, #tpu.memory_space<vmem>>, vector<1x32x32xf32>
    %24 = vector.shape_cast %23 : vector<1x32x32xf32> to vector<32x32xf32>
    %cst_18 = arith.constant dense<0.000000e+00> : vector<128x32xf32>
    %25 = tpu.matmul %22, %24, %cst_18 {dimension_numbers = #tpu.dot_dimension_numbers<[1], [0], [0], [1], [0, 0, 1, 1], [], []>} : vector<128x32xf32>, vector<32x32xf32>, vector<128x32xf32> -> vector<128x32xf32>
    %c1_19 = arith.constant 1 : index
    %c0_20 = arith.constant 0 : index
    %c0_21 = arith.constant 0 : index
    %26 = vector.load %arg5[%c1_19, %c0_20, %c0_21] : memref<2x1x32xf32, #tpu.memory_space<vmem>>, vector<1x1x32xf32>
    %27 = vector.shape_cast %26 : vector<1x1x32xf32> to vector<1x32xf32>
    %28 = vector.broadcast %27 : vector<1x32xf32> to vector<128x32xf32>
    %29 = arith.addf %25, %28 : vector<128x32xf32>
    %cst_22 = arith.constant 0.000000e+00 : f32
    %30 = vector.broadcast %cst_22 : f32 to vector<128x32xf32>
    %31 = arith.cmpf oge, %29, %30 : vector<128x32xf32>
    %cst_23 = arith.constant 0.00999999977 : f32
    %32 = vector.broadcast %cst_23 : f32 to vector<128x32xf32>
    %33 = arith.mulf %32, %29 : vector<128x32xf32>
    %34 = arith.select %31, %29, %33 : vector<128x32xi1>, vector<128x32xf32>
    %c0_24 = arith.constant 0 : index
    %c0_25 = arith.constant 0 : index
    %35 = vector.load %arg6[%c0_24, %c0_25] : memref<32x16xf32, #tpu.memory_space<vmem>>, vector<32x16xf32>
    %cst_26 = arith.constant dense<0.000000e+00> : vector<128x16xf32>
    %36 = tpu.matmul %34, %35, %cst_26 {dimension_numbers = #tpu.dot_dimension_numbers<[1], [0], [0], [1], [0, 0, 1, 1], [], []>} : vector<128x32xf32>, vector<32x16xf32>, vector<128x16xf32> -> vector<128x16xf32>
    %c0_27 = arith.constant 0 : index
    %c0_28 = arith.constant 0 : index
    %37 = vector.load %arg7[%c0_27, %c0_28] : memref<1x16xf32, #tpu.memory_space<vmem>>, vector<1x16xf32>
    %38 = vector.broadcast %37 : vector<1x16xf32> to vector<128x16xf32>
    %39 = arith.addf %36, %38 : vector<128x16xf32>
    %c0_29 = arith.constant 0 : index
    %c0_30 = arith.constant 0 : index
    %40 = vector.load %arg10[%c0_29, %c0_30] : memref<128x16xf32, #tpu.memory_space<vmem>>, vector<128x16xf32>
    tpu.vector_store %arg10[%c0_29, %c0_30], %39 {strides = array<i32>} : memref<128x16xf32, #tpu.memory_space<vmem>>, vector<128x16xf32>,
    %c0_31 = arith.constant 0 : index
    %c0_32 = arith.constant 0 : index
    %41 = vector.load %arg8[%c0_31, %c0_32] : memref<32x16xf32, #tpu.memory_space<vmem>>, vector<32x16xf32>
    %cst_33 = arith.constant dense<0.000000e+00> : vector<128x16xf32>
    %42 = tpu.matmul %34, %41, %cst_33 {dimension_numbers = #tpu.dot_dimension_numbers<[1], [0], [0], [1], [0, 0, 1, 1], [], []>} : vector<128x32xf32>, vector<32x16xf32>, vector<128x16xf32> -> vector<128x16xf32>
    %c0_34 = arith.constant 0 : index
    %c0_35 = arith.constant 0 : index
    %43 = vector.load %arg9[%c0_34, %c0_35] : memref<1x16xf32, #tpu.memory_space<vmem>>, vector<1x16xf32>
    %44 = vector.broadcast %43 : vector<1x16xf32> to vector<128x16xf32>
    %45 = arith.addf %42, %44 : vector<128x16xf32>
    %c0_36 = arith.constant 0 : index
    %c0_37 = arith.constant 0 : index
    %46 = vector.load %arg11[%c0_36, %c0_37] : memref<128x16xf32, #tpu.memory_space<vmem>>, vector<128x16xf32>
    tpu.vector_store %arg11[%c0_36, %c0_37], %45 {strides = array<i32>} : memref<128x16xf32, #tpu.memory_space<vmem>>, vector<128x16xf32>,
    return
  }
  func.func @transform_0(%arg0: i32) -> (i32, i32) {
    %c0_i32 = arith.constant 0 : i32
    %c0_i32_0 = arith.constant 0 : i32
    return %arg0, %c0_i32 : i32, i32
  }
  func.func @transform_1(%arg0: i32) -> (i32, i32) {
    %c0_i32 = arith.constant 0 : i32
    %c0_i32_0 = arith.constant 0 : i32
    %c0_i32_1 = arith.constant 0 : i32
    return %c0_i32, %c0_i32_0 : i32, i32
  }
  func.func @transform_2(%arg0: i32) -> (i32, i32) {
    %c0_i32 = arith.constant 0 : i32
    %c0_i32_0 = arith.constant 0 : i32
    %c0_i32_1 = arith.constant 0 : i32
    return %c0_i32, %c0_i32_0 : i32, i32
  }
  func.func @transform_3(%arg0: i32) -> (i32, i32, i32) {
    %c0_i32 = arith.constant 0 : i32
    %c0_i32_0 = arith.constant 0 : i32
    %c0_i32_1 = arith.constant 0 : i32
    %c0_i32_2 = arith.constant 0 : i32
    return %c0_i32, %c0_i32_0, %c0_i32_1 : i32, i32, i32
  }
  func.func @transform_4(%arg0: i32) -> (i32, i32, i32) {
    %c0_i32 = arith.constant 0 : i32
    %c0_i32_0 = arith.constant 0 : i32
    %c0_i32_1 = arith.constant 0 : i32
    %c0_i32_2 = arith.constant 0 : i32
    return %c0_i32, %c0_i32_0, %c0_i32_1 : i32, i32, i32
  }
  func.func @transform_5(%arg0: i32) -> (i32, i32) {
    %c0_i32 = arith.constant 0 : i32
    %c0_i32_0 = arith.constant 0 : i32
    %c0_i32_1 = arith.constant 0 : i32
    return %c0_i32, %c0_i32_0 : i32, i32
  }
  func.func @transform_6(%arg0: i32) -> (i32, i32) {
    %c0_i32 = arith.constant 0 : i32
    %c0_i32_0 = arith.constant 0 : i32
    %c0_i32_1 = arith.constant 0 : i32
    return %c0_i32, %c0_i32_0 : i32, i32
  }
  func.func @transform_7(%arg0: i32) -> (i32, i32) {
    %c0_i32 = arith.constant 0 : i32
    %c0_i32_0 = arith.constant 0 : i32
    %c0_i32_1 = arith.constant 0 : i32
    return %c0_i32, %c0_i32_0 : i32, i32
  }
  func.func @transform_8(%arg0: i32) -> (i32, i32) {
    %c0_i32 = arith.constant 0 : i32
    %c0_i32_0 = arith.constant 0 : i32
    %c0_i32_1 = arith.constant 0 : i32
    return %c0_i32, %c0_i32_0 : i32, i32
  }
  func.func @transform_9(%arg0: i32) -> (i32, i32) {
    %c0_i32 = arith.constant 0 : i32
    %c0_i32_0 = arith.constant 0 : i32
    return %arg0, %c0_i32 : i32, i32
  }
  func.func @transform_10(%arg0: i32) -> (i32, i32) {
    %c0_i32 = arith.constant 0 : i32
    %c0_i32_0 = arith.constant 0 : i32
    return %arg0, %c0_i32 : i32, i32
  }
}

</mosaic_0001>

<bundles_post_ra>
// kernel: tpu_custom_call.1
= control target key start
LH: loop header
LB: loop body
LE: loop exit
PB: predicated region body
PF: predicated region fallthrough
CT: control target
= control target key end

     0   :  { %s2099_s13 = smov 0   ;;  %s2450_s0 = inlined_call_operand.vmem [shape: f32[256,16], index: 0, kind: input, shape index: {}]   ;;  %s2451_s1 = inlined_call_operand.vmem [shape: f32[16,32], index: 1, kind: input, shape index: {}]   ;;  %s2452_s2 = inlined_call_operand.vmem [shape: f32[1,32], index: 2, kind: input, shape index: {}]   ;;  %s2453_s3 = inlined_call_operand.vmem [shape: f32[2,32,32], index: 3, kind: input, shape index: {}]   ;;  %s2454_s4 = inlined_call_operand.vmem [shape: f32[2,1,32], index: 4, kind: input, shape index: {}]   ;;  %s2455_s5 = inlined_call_operand.vmem [shape: f32[32,16], index: 5, kind: input, shape index: {}]   ;;  %s2456_s6 = inlined_call_operand.vmem [shape: f32[1,16], index: 6, kind: input, shape index: {}]   ;;  %s2457_s7 = inlined_call_operand.vmem [shape: f32[32,16], index: 7, kind: input, shape index: {}]   ;;  %s2458_s8 = inlined_call_operand.vmem [shape: f32[1,16], index: 8, kind: input, shape index: {}]   ;;  %s2459_s9 = inlined_call_operand.vmem [shape: f32[256,16], index: 9, kind: output, shape index: {0}]   ;;  %s2460_s10 = inlined_call_operand.vmem [shape: f32[256,16], index: 10, kind: output, shape index: {1}]  }
   0x1 LB: > { %s1633_s14 = sadd.s32 4294967295, %s2042_s13   ;;  %p1637_p0 = scmp.ge.s32.totalorder %s2042_s13, 1  ;;  %s2042_s13 = sphi %s2099_s13, %s21_s13  }
   0x2   : > { %p316_p1 = scmp.lt.s32.totalorder %s2042_s13, 3 }
   0x4   : > { %p317_p2 = pnand %p1637_p0, %p316_p1 }
   0x5   : > { %v393_v0 = vld [vmem:[%s2451_s1] sm:$0xff] (!%p317_p2)  ;;  %v394_v1 = vld [vmem:[%s2451_s1 + $0x8] sm:$0xff] (!%p317_p2)  ;;  %s1638_s19 = sshll.u32 (!%p317_p2), %s1633_s14, 4  ;;  %vm402_vm0 = vcmask (!%p317_p2), 130048   ;;  %v646_v6 = vld [vmem:[%s2453_s3 + $0x10] sm:$0xff] (!%p317_p2)  ;;  %vm655_vm3 = vcmask (!%p317_p2), 261120  }
   0x6   : > { %320 = sbr.rel (%p317_p2) target bundleno = 919 (0x397), region = 56  ;;  %v644_v2 = vld [vmem:[%s2453_s3] sm:$0xff] (!%p317_p2)  ;;  %v1990_v3 = vpack.c.bf16 (!%p317_p2), %v394_v1, %v393_v0  ;;  %p360_p3 = scmp.lt.s32.totalorder (!%p317_p2), %s1638_s19, 31  ;;  %v645_v4 = vld [vmem:[%s2453_s3 + $0x8] sm:$0xff] (!%p317_p2)  ;;  %v647_v7 = vld [vmem:[%s2453_s3 + $0x18] sm:$0xff] (!%p317_p2) }
   0x7   : > { %v1994_v5 = vpack.c.bf16 (!%p317_p2), %v645_v4, %v644_v2  ;;  %v1998_v12 = vpack.c.bf16 (!%p317_p2), %v647_v7, %v646_v6  ;;  %v1678_v25 = vld [vmem:[%s2453_s3 + $0x20] sm:$0xff] (!%p317_p2)  ;;  %v1679_v26 = vld [vmem:[%s2453_s3 + $0x28] sm:$0xff] (!%p317_p2)  ;;  %v1680_v27 = vld [vmem:[%s2453_s3 + $0x30] sm:$0xff] (!%p317_p2) }
   0x8   : > { %1991 = vmatprep.subr.bf16.mxu0 (!%p317_p2), %v1990_v3  ;;  %2026 = vmatprep.subr.bf16.mxu1 (!%p317_p2), %v1990_v3  ;;  %v2002_v28 = vpack.c.bf16 (!%p317_p2), %v1679_v26, %v1678_v25  ;;  %v1681_v29 = vld [vmem:[%s2453_s3 + $0x38] sm:$0xff] (!%p317_p2)  ;;  %v2180_v31 = vld [vmem:[%s2452_s2] ss:$0 sm:$0xff] (!%p317_p2) }
   0x9   : > { %1993 = vmatpush3.bf16.msra.mxu0 (!%p317_p2), %v1990_v3  ;;  %2027 = vmatpush3.bf16.msra.mxu1 (!%p317_p2), %v1990_v3  ;;  %v2006_v30 = vpack.c.bf16 (!%p317_p2), %v1681_v29, %v1680_v27 }
   0xa   : > { %1995 = vmatprep.subr.bf16.mxu1 (!%p317_p2), %v1994_v5  ;;  %2003 = vmatprep.subr.bf16.mxu0 (!%p317_p2), %v2002_v28 }
   0xd   : > { %s2462_s19 = smov (!%p360_p3, %s1638_s19), 31 }
   0xe   : > { %s2119_s24 = sshll.u32 %s2462_s19, 3 }
   0xf   : > { %s2125_s27 = scalar_lea.vmem %s2450_s0, %s2119_s24  ;;  %s2343_s12 = scalar_lea.vmem %s2459_s9, %s2119_s24 }
  0x10   : > { %v377_v8 = vld [vmem:[%s2125_s27] sm:$0xff]  ;;  %v378_v9 = vld [vmem:[%s2125_s27 + $0x8] sm:$0xff]  ;;  %v379_v10 = vld [vmem:[%s2125_s27 + $0x10] sm:$0xff]  ;;  %s2349_s16 = scalar_lea.vmem %s2460_s10, %s2119_s24 }
  0x11   : > { %1838 = vmatprep.mubr.msk.f32.mxu0 %vm402_vm0, %v377_v8  ;;  %v385_v11 = vld [vmem:[%s2125_s27 + $0x40] sm:$0xff]  ;;  %v380_v13 = vld [vmem:[%s2125_s27 + $0x18] sm:$0xff]  ;;  %v386_v14 = vld [vmem:[%s2125_s27 + $0x48] sm:$0xff] }
  0x12   : > { %1839 = vmatmul.mubr.msk.f32.vlgmr.msra.gmra.mrb[0].mxu0 %vm402_vm0, %v378_v9  ;;  %1850 = vmatprep.mubr.msk.f32.mxu1 %vm402_vm0, %v385_v11  ;;  %v387_v15 = vld [vmem:[%s2125_s27 + $0x50] sm:$0xff]  ;;  %v381_v16 = vld [vmem:[%s2125_s27 + $0x20] sm:$0xff]  ;;  %v388_v17 = vld [vmem:[%s2125_s27 + $0x58] sm:$0xff] }
  0x13   : > { %1841 = vmatprep.mubr.msk.f32.mxu0 %vm402_vm0, %v379_v10  ;;  %1851 = vmatmul.mubr.msk.f32.vlgmr.msra.gmra.mrb[0].mxu1 %vm402_vm0, %v386_v14  ;;  %v389_v18 = vld [vmem:[%s2125_s27 + $0x60] sm:$0xff]  ;;  %v382_v19 = vld [vmem:[%s2125_s27 + $0x28] sm:$0xff]  ;;  %v383_v20 = vld [vmem:[%s2125_s27 + $0x30] sm:$0xff] }
  0x14   : > { %1853 = vmatprep.mubr.msk.f32.mxu1 %vm402_vm0, %v387_v15  ;;  %1997 = vmatpush3.bf16.msra.mxu1 %v1994_v5  ;;  %v390_v21 = vld [vmem:[%s2125_s27 + $0x68] sm:$0xff]  ;;  %v391_v22 = vld [vmem:[%s2125_s27 + $0x70] sm:$0xff]  ;;  %v384_v23 = vld [vmem:[%s2125_s27 + $0x38] sm:$0xff] }
  0x15   : > { %1999 = vmatprep.subr.bf16.mxu1 %v1998_v12  ;;  %v392_v24 = vld [vmem:[%s2125_s27 + $0x78] sm:$0xff]  ;;  %2005 = vmatpush3.bf16.msra.mxu0 %v2002_v28 }
  0x16   : > { %1842 = vmatmul.mubr.msk.f32.gmra.mrb[2].mxu0 %vm402_vm0, %v380_v13  ;;  %2007 = vmatprep.subr.bf16.mxu0 %v2006_v30 }
  0x17   : > { %1844 = vmatprep.mubr.msk.f32.mxu0 %vm402_vm0, %v381_v16  ;;  %1854 = vmatmul.mubr.msk.f32.gmra.mrb[2].mxu1 %vm402_vm0, %v388_v17 }
  0x18   : > { %1856 = vmatprep.mubr.msk.f32.mxu1 %vm402_vm0, %v389_v18  ;;  %2001 = vmatpush3.bf16.msra.mxu1 %v1998_v12 }
  0x19   : > { %2009 = vmatpush3.bf16.msra.mxu0 %v2006_v30 }
  0x1a   : > { %1845 = vmatmul.mubr.msk.f32.gmra.mrb[4].mxu0 %vm402_vm0, %v382_v19 }
  0x1b   : > { %1847 = vmatprep.mubr.msk.f32.mxu0 %vm402_vm0, %v383_v20  ;;  %1857 = vmatmul.mubr.msk.f32.gmra.mrb[4].mxu1 %vm402_vm0, %v390_v21 }
  0x1c   : > { %1859 = vmatprep.mubr.msk.f32.mxu1 %vm402_vm0, %v391_v22 }
  0x1e   : > { %1848 = vmatmul.mubr.msk.f32.gmra.mrb[6].mxu0 %vm402_vm0, %v384_v23 }
  0x1f   : > { %1860 = vmatmul.mubr.msk.f32.gmra.mrb[6].mxu1 %vm402_vm0, %v392_v24 }
  0xe5   : > { %v1840_v32 = vpop.f32.mrb[0].mxu0 }
  0xe6   : > { %v523_v33 = vadd.f32 %v1840_v32, %v2180_v31  ;;  %v517_v34 = vpop.f32.mrb[1].mxu0  ;;  %v1852_v36 = vpop.f32.mrb[0].mxu1 }
  0xe7   : > { %v518_v35 = vadd.f32 %v2180_v31, %v517_v34  ;;  %v557_v38 = vpop.f32.mrb[1].mxu1  ;;  %v563_v6 = vadd.f32 %v1852_v36, %v2180_v31  ;;  %v1371_v34 = vld [vmem:[%s2457_s7] sm:$0xff]  ;;  %v1372_v36 = vld [vmem:[%s2457_s7 + $0x8] sm:$0xff] }
  0xe8   : > { %v613_v37 = vmul.f32 0.01, %v523_v33  ;;  %vm597_vm1 = vcmp.ge.f32.partialorder %v523_v33, 0.0  ;;  %v558_v55 = vadd.f32 %v2180_v31, %v557_v38  ;;  %v1154_v38 = vld [vmem:[%s2455_s5 + $0x18] sm:$0xff] }
  0xe9   : > { %vm596_vm2 = vcmp.ge.f32.partialorder %v518_v35, 0.0  ;;  %v612_v39 = vmul.f32 0.01, %v518_v35  ;;  %v1843_v40 = vpop.f32.mrb[2].mxu0  ;;  %v621_v14 = vmul.f32 0.01, %v563_v6 }
  0xea   : > { %v533_v41 = vadd.f32 %v1843_v40, %v2180_v31  ;;  %v527_v42 = vpop.f32.mrb[3].mxu0  ;;  %v1855_v45 = vpop.f32.mrb[2].mxu1  ;;  %v629_v46 = vsel %vm597_vm1, %v523_v33, %v613_v37  ;;  %v620_v1 = vmul.f32 0.01, %v558_v55  ;;  %vm604_vm8 = vcmp.ge.f32.partialorder %v558_v55, 0.0  ;;  %v1152_v33 = vld [vmem:[%s2455_s5 + $0x8] sm:$0xff] }
  0xeb   : > { %v528_v43 = vadd.f32 %v2180_v31, %v527_v42  ;;  %v628_v44 = vsel %vm596_vm2, %v518_v35, %v612_v39  ;;  %v567_v48 = vpop.f32.mrb[3].mxu1  ;;  %v573_v15 = vadd.f32 %v1855_v45, %v2180_v31  ;;  %vm605_vm12 = vcmp.ge.f32.partialorder %v563_v6, 0.0  ;;  %v1153_v37 = vld [vmem:[%s2455_s5 + $0x10] sm:$0xff] }
  0xec   : > { %v615_v47 = vmul.f32 0.01, %v533_v41  ;;  %1870 = vmatprep.mubr.msk.f32.mxu1 %vm655_vm3, %v628_v44  ;;  %vm599_vm4 = vcmp.ge.f32.partialorder %v533_v41, 0.0  ;;  %v568_v3 = vadd.f32 %v2180_v31, %v567_v48  ;;  %v636_v12 = vsel %vm604_vm8, %v558_v55, %v620_v1  ;;  %v1374_v48 = vld [vmem:[%s2457_s7 + $0x18] sm:$0xff] }
  0xed   : > { %vm598_vm5 = vcmp.ge.f32.partialorder %v528_v43, 0.0  ;;  %v614_v49 = vmul.f32 0.01, %v528_v43  ;;  %v1846_v50 = vpop.f32.mrb[4].mxu0  ;;  %1871 = vmatmul.mubr.msk.f32.vlgmr.msra.gmra.mrb[8].mxu1 %vm655_vm3, %v629_v46  ;;  %v623_v20 = vmul.f32 0.01, %v573_v15  ;;  %v637_v22 = vsel %vm605_vm12, %v563_v6, %v621_v14 }
  0xee   : > { %v543_v51 = vadd.f32 %v1846_v50, %v2180_v31  ;;  %v537_v52 = vpop.f32.mrb[5].mxu0  ;;  %v1858_v56 = vpop.f32.mrb[4].mxu1  ;;  %v631_v58 = vsel %vm599_vm4, %v533_v41, %v615_v47  ;;  %v622_v10 = vmul.f32 0.01, %v568_v3  ;;  %vm606_vm11 = vcmp.ge.f32.partialorder %v568_v3, 0.0  ;;  %v1373_v47 = vld [vmem:[%s2457_s7 + $0x10] sm:$0xff] }
  0xef   : > { %v538_v53 = vadd.f32 %v2180_v31, %v537_v52  ;;  %v630_v54 = vsel %vm598_vm5, %v528_v43, %v614_v49  ;;  %v577_v59 = vpop.f32.mrb[5].mxu1  ;;  %v583_v21 = vadd.f32 %v1858_v56, %v2180_v31  ;;  %vm607_vm14 = vcmp.ge.f32.partialorder %v573_v15, 0.0  ;;  %v2236_v41 = vld [vmem:[%s2454_s4] ss:$0 sm:$0xff] }
  0xf0   : > { %v617_v57 = vmul.f32 0.01, %v543_v51  ;;  %1873 = vmatprep.mubr.msk.f32.mxu1 %vm655_vm3, %v630_v54  ;;  %vm601_vm6 = vcmp.ge.f32.partialorder %v543_v51, 0.0  ;;  %v578_v13 = vadd.f32 %v2180_v31, %v577_v59  ;;  %v638_v18 = vsel %vm606_vm11, %v568_v3, %v622_v10 }
  0xf1   : > { %vm600_vm7 = vcmp.ge.f32.partialorder %v538_v53, 0.0  ;;  %v616_v60 = vmul.f32 0.01, %v538_v53  ;;  %v1849_v61 = vpop.f32.mrb[6].mxu0  ;;  %1874 = vmatmul.mubr.msk.f32.gmra.mrb[10].mxu1 %vm655_vm3, %v631_v58  ;;  %v625_v25 = vmul.f32 0.01, %v583_v21  ;;  %v639_v27 = vsel %vm607_vm14, %v573_v15, %v623_v20 }
  0xf2   : > { %v553_v62 = vadd.f32 %v1849_v61, %v2180_v31  ;;  %v547_v63 = vpop.f32.mrb[7].mxu0  ;;  %v1861_v4 = vpop.f32.mrb[6].mxu1  ;;  %v633_v7 = vsel %vm601_vm6, %v543_v51, %v617_v57  ;;  %v624_v17 = vmul.f32 0.01, %v578_v13  ;;  %vm608_vm13 = vcmp.ge.f32.partialorder %v578_v13, 0.0 }
  0xf3   : > { %v548_v0 = vadd.f32 %v2180_v31, %v547_v63  ;;  %v632_v2 = vsel %vm600_vm7, %v538_v53, %v616_v60  ;;  %v587_v8 = vpop.f32.mrb[7].mxu1  ;;  %v593_v26 = vadd.f32 %v1861_v4, %v2180_v31  ;;  %vm609_vm1 = vcmp.ge.f32.partialorder %v583_v21, 0.0 }
  0xf4   : > { %v619_v5 = vmul.f32 0.01, %v553_v62  ;;  %1876 = vmatprep.mubr.msk.f32.mxu1 %vm655_vm3, %v632_v2  ;;  %vm603_vm9 = vcmp.ge.f32.partialorder %v553_v62, 0.0  ;;  %v588_v19 = vadd.f32 %v2180_v31, %v587_v8  ;;  %v640_v24 = vsel %vm608_vm13, %v578_v13, %v624_v17  ;;  %v1151_v31 = vld [vmem:[%s2455_s5] sm:$0xff] }
  0xf5   : > { %vm602_vm10 = vcmp.ge.f32.partialorder %v548_v0, 0.0  ;;  %v618_v9 = vmul.f32 0.01, %v548_v0  ;;  %1877 = vmatmul.mubr.msk.f32.gmra.mrb[12].mxu1 %vm655_vm3, %v633_v7  ;;  %v627_v29 = vmul.f32 0.01, %v593_v26  ;;  %v641_v30 = vsel %vm609_vm1, %v583_v21, %v625_v25 }
  0xf6   : > { %v635_v16 = vsel %vm603_vm9, %v553_v62, %v619_v5  ;;  %v626_v23 = vmul.f32 0.01, %v588_v19  ;;  %vm610_vm15 = vcmp.ge.f32.partialorder %v588_v19, 0.0  ;;  %vm611_vm2 = vcmp.ge.f32.partialorder %v593_v26, 0.0 }
  0xf7   : > { %v634_v11 = vsel %vm602_vm10, %v548_v0, %v618_v9  ;;  %v643_v32 = vsel %vm611_vm2, %v593_v26, %v627_v29  ;;  %v2010_v35 = vpack.c.bf16 %v1152_v33, %v1151_v31  ;;  %v2018_v39 = vpack.c.bf16 %v1372_v36, %v1371_v34 }
  0xf8   : > { %1879 = vmatprep.mubr.msk.f32.mxu1 %vm655_vm3, %v634_v11  ;;  %v642_v28 = vsel %vm610_vm15, %v588_v19, %v626_v23  ;;  %v2014_v40 = vpack.c.bf16 %v1154_v38, %v1153_v37  ;;  %v2022_v55 = vpack.c.bf16 %v1374_v48, %v1373_v47 }
  0xf9   : > { %1880 = vmatmul.mubr.msk.f32.gmra.mrb[14].mxu1 %vm655_vm3, %v635_v16  ;;  %2011 = vmatprep.subr.bf16.mxu1 %v2010_v35 }
  0xfa   : > { %1882 = vmatprep.mubr.msk.f32.mxu1 %vm655_vm3, %v636_v12  ;;  %2019 = vmatprep.subr.bf16.mxu0 %v2018_v39 }
  0xfb   : > { %2013 = vmatpush3.bf16.msra.mxu1 %v2010_v35 }
  0xfc   : > { %2015 = vmatprep.subr.bf16.mxu1 %v2014_v40 }
  0xfd   : > { %1883 = vmatmul.mubr.msk.f32.gmra.mrb[16].mxu1 %vm655_vm3, %v637_v22 }
  0xfe   : > { %1885 = vmatprep.mubr.msk.f32.mxu1 %vm655_vm3, %v638_v18 }
  0xff   : > { %2017 = vmatpush3.bf16.msra.mxu1 %v2014_v40 }
 0x101   : > { %1886 = vmatmul.mubr.msk.f32.gmra.mrb[18].mxu1 %vm655_vm3, %v639_v27 }
 0x102   : > { %1888 = vmatprep.mubr.msk.f32.mxu1 %vm655_vm3, %v640_v24 }
 0x105   : > { %1889 = vmatmul.mubr.msk.f32.gmra.mrb[20].mxu1 %vm655_vm3, %v641_v30 }
 0x106   : > { %1891 = vmatprep.mubr.msk.f32.mxu1 %vm655_vm3, %v642_v28 }
 0x109   : > { %1892 = vmatmul.mubr.msk.f32.gmra.mrb[22].mxu1 %vm655_vm3, %v643_v32 }
 0x1c0   : > { %v1872_v42 = vpop.f32.mrb[8].mxu1 }
 0x1c1   : > { %v776_v43 = vadd.f32 %v1872_v42, %v2236_v41  ;;  %v770_v44 = vpop.f32.mrb[9].mxu1 }
 0x1c2   : > { %v771_v45 = vadd.f32 %v2236_v41, %v770_v44 }
 0x1c3   : > { %v866_v46 = vmul.f32 0.01, %v776_v43  ;;  %vm850_vm4 = vcmp.ge.f32.partialorder %v776_v43, 0.0 }
 0x1c4   : > { %vm849_vm5 = vcmp.ge.f32.partialorder %v771_v45, 0.0  ;;  %v865_v49 = vmul.f32 0.01, %v771_v45  ;;  %v1875_v50 = vpop.f32.mrb[10].mxu1 }
 0x1c5   : > { %v786_v51 = vadd.f32 %v1875_v50, %v2236_v41  ;;  %v780_v52 = vpop.f32.mrb[11].mxu1  ;;  %v882_v56 = vsel %vm850_vm4, %v776_v43, %v866_v46 }
 0x1c6   : > { %v781_v53 = vadd.f32 %v2236_v41, %v780_v52  ;;  %v881_v54 = vsel %vm849_vm5, %v771_v45, %v865_v49 }
 0x1c7   : > { %v868_v57 = vmul.f32 0.01, %v786_v51  ;;  %1902 = vmatprep.mubr.msk.f32.mxu0 %vm655_vm3, %v881_v54  ;;  %vm852_vm6 = vcmp.ge.f32.partialorder %v786_v51, 0.0 }
 0x1c8   : > { %vm851_vm7 = vcmp.ge.f32.partialorder %v781_v53, 0.0  ;;  %v867_v58 = vmul.f32 0.01, %v781_v53  ;;  %v1878_v59 = vpop.f32.mrb[12].mxu1  ;;  %1903 = vmatmul.mubr.msk.f32.vlgmr.msra.gmra.mrb[8].mxu0 %vm655_vm3, %v882_v56 }
 0x1c9   : > { %v796_v60 = vadd.f32 %v1878_v59, %v2236_v41  ;;  %v790_v61 = vpop.f32.mrb[13].mxu1  ;;  %2021 = vmatpush3.bf16.msra.mxu0 %v2018_v39  ;;  %v884_v1 = vsel %vm852_vm6, %v786_v51, %v868_v57 }
 0x1ca   : > { %v791_v62 = vadd.f32 %v2236_v41, %v790_v61  ;;  %v883_v63 = vsel %vm851_vm7, %v781_v53, %v867_v58  ;;  %2023 = vmatprep.subr.bf16.mxu0 %v2022_v55 }
 0x1cb   : > { %v870_v0 = vmul.f32 0.01, %v796_v60  ;;  %1905 = vmatprep.mubr.msk.f32.mxu0 %vm655_vm3, %v883_v63  ;;  %vm854_vm8 = vcmp.ge.f32.partialorder %v796_v60, 0.0 }
 0x1cc   : > { %vm853_vm9 = vcmp.ge.f32.partialorder %v791_v62, 0.0  ;;  %v869_v2 = vmul.f32 0.01, %v791_v62  ;;  %v1881_v3 = vpop.f32.mrb[14].mxu1  ;;  %1906 = vmatmul.mubr.msk.f32.gmra.mrb[10].mxu0 %vm655_vm3, %v884_v1 }
 0x1cd   : > { %v806_v4 = vadd.f32 %v1881_v3, %v2236_v41  ;;  %v800_v5 = vpop.f32.mrb[15].mxu1  ;;  %2025 = vmatpush3.bf16.msra.mxu0 %v2022_v55  ;;  %v886_v9 = vsel %vm854_vm8, %v796_v60, %v870_v0 }
 0x1ce   : > { %v801_v6 = vadd.f32 %v2236_v41, %v800_v5  ;;  %v885_v7 = vsel %vm853_vm9, %v791_v62, %v869_v2 }
 0x1cf   : > { %v872_v8 = vmul.f32 0.01, %v806_v4  ;;  %1908 = vmatprep.mubr.msk.f32.mxu0 %vm655_vm3, %v885_v7  ;;  %vm856_vm10 = vcmp.ge.f32.partialorder %v806_v4, 0.0 }
 0x1d0   : > { %vm855_vm11 = vcmp.ge.f32.partialorder %v801_v6, 0.0  ;;  %v871_v10 = vmul.f32 0.01, %v801_v6  ;;  %v1884_v11 = vpop.f32.mrb[16].mxu1  ;;  %1909 = vmatmul.mubr.msk.f32.gmra.mrb[12].mxu0 %vm655_vm3, %v886_v9 }
 0x1d1   : > { %v816_v12 = vadd.f32 %v1884_v11, %v2236_v41  ;;  %v810_v13 = vpop.f32.mrb[17].mxu1  ;;  %v888_v17 = vsel %vm856_vm10, %v806_v4, %v872_v8 }
 0x1d2   : > { %v811_v14 = vadd.f32 %v2236_v41, %v810_v13  ;;  %v887_v15 = vsel %vm855_vm11, %v801_v6, %v871_v10 }
 0x1d3   : > { %v874_v16 = vmul.f32 0.01, %v816_v12  ;;  %1911 = vmatprep.mubr.msk.f32.mxu0 %vm655_vm3, %v887_v15  ;;  %vm858_vm12 = vcmp.ge.f32.partialorder %v816_v12, 0.0 }
 0x1d4   : > { %vm857_vm13 = vcmp.ge.f32.partialorder %v811_v14, 0.0  ;;  %v873_v18 = vmul.f32 0.01, %v811_v14  ;;  %v1887_v19 = vpop.f32.mrb[18].mxu1  ;;  %1912 = vmatmul.mubr.msk.f32.gmra.mrb[14].mxu0 %vm655_vm3, %v888_v17 }
 0x1d5   : > { %v826_v20 = vadd.f32 %v1887_v19, %v2236_v41  ;;  %v820_v21 = vpop.f32.mrb[19].mxu1  ;;  %v890_v25 = vsel %vm858_vm12, %v816_v12, %v874_v16 }
 0x1d6   : > { %v821_v22 = vadd.f32 %v2236_v41, %v820_v21  ;;  %v889_v23 = vsel %vm857_vm13, %v811_v14, %v873_v18 }
 0x1d7   : > { %v876_v24 = vmul.f32 0.01, %v826_v20  ;;  %1914 = vmatprep.mubr.msk.f32.mxu0 %vm655_vm3, %v889_v23  ;;  %vm860_vm14 = vcmp.ge.f32.partialorder %v826_v20, 0.0 }
 0x1d8   : > { %vm859_vm15 = vcmp.ge.f32.partialorder %v821_v22, 0.0  ;;  %v875_v26 = vmul.f32 0.01, %v821_v22  ;;  %v1890_v27 = vpop.f32.mrb[20].mxu1  ;;  %1915 = vmatmul.mubr.msk.f32.gmra.mrb[16].mxu0 %vm655_vm3, %v890_v25 }
 0x1d9   : > { %v836_v28 = vadd.f32 %v1890_v27, %v2236_v41  ;;  %v830_v29 = vpop.f32.mrb[21].mxu1  ;;  %v892_v33 = vsel %vm860_vm14, %v826_v20, %v876_v24 }
 0x1da   : > { %v831_v30 = vadd.f32 %v2236_v41, %v830_v29  ;;  %v891_v32 = vsel %vm859_vm15, %v821_v22, %v875_v26 }
 0x1db   : > { %v878_v31 = vmul.f32 0.01, %v836_v28  ;;  %1917 = vmatprep.mubr.msk.f32.mxu0 %vm655_vm3, %v891_v32  ;;  %vm862_vm1 = vcmp.ge.f32.partialorder %v836_v28, 0.0 }
 0x1dc   : > { %vm861_vm2 = vcmp.ge.f32.partialorder %v831_v30, 0.0  ;;  %v877_v34 = vmul.f32 0.01, %v831_v30  ;;  %v1893_v35 = vpop.f32.mrb[22].mxu1  ;;  %1918 = vmatmul.mubr.msk.f32.gmra.mrb[18].mxu0 %vm655_vm3, %v892_v33 }
 0x1dd   : > { %v846_v36 = vadd.f32 %v1893_v35, %v2236_v41  ;;  %v840_v37 = vpop.f32.mrb[23].mxu1  ;;  %v894_v42 = vsel %vm862_vm1, %v836_v28, %v878_v31 }
 0x1de   : > { %v841_v38 = vadd.f32 %v2236_v41, %v840_v37  ;;  %v893_v39 = vsel %vm861_vm2, %v831_v30, %v877_v34  ;;  %v2279_v41 = vld [vmem:[%s2454_s4 + $0x1] ss:$0 sm:$0xff] }
 0x1df   : > { %v880_v40 = vmul.f32 0.01, %v846_v36  ;;  %1920 = vmatprep.mubr.msk.f32.mxu0 %vm655_vm3, %v893_v39  ;;  %vm864_vm4 = vcmp.ge.f32.partialorder %v846_v36, 0.0 }
 0x1e0   : > { %vm863_vm5 = vcmp.ge.f32.partialorder %v841_v38, 0.0  ;;  %v879_v43 = vmul.f32 0.01, %v841_v38  ;;  %1921 = vmatmul.mubr.msk.f32.gmra.mrb[20].mxu0 %vm655_vm3, %v894_v42 }
 0x1e1   : > { %v896_v45 = vsel %vm864_vm4, %v846_v36, %v880_v40 }
 0x1e2   : > { %v895_v44 = vsel %vm863_vm5, %v841_v38, %v879_v43 }
 0x1e3   : > { %1923 = vmatprep.mubr.msk.f32.mxu0 %vm655_vm3, %v895_v44 }
 0x1e4   : > { %1924 = vmatmul.mubr.msk.f32.gmra.mrb[22].mxu0 %vm655_vm3, %v896_v45 }
 0x29b   : > { %v1904_v46 = vpop.f32.mrb[8].mxu0 }
 0x29c   : > { %v1030_v47 = vadd.f32 %v1904_v46, %v2279_v41  ;;  %v1024_v48 = vpop.f32.mrb[9].mxu0  ;;  %v2332_v46 = vld [vmem:[%s2456_s6] ss:$0 sm:$0xff] }
 0x29d   : > { %v1025_v49 = vadd.f32 %v2279_v41, %v1024_v48 }
 0x29e   : > { %v1120_v50 = vmul.f32 0.01, %v1030_v47  ;;  %vm1104_vm6 = vcmp.ge.f32.partialorder %v1030_v47, 0.0 }
 0x29f   : > { %vm1103_vm7 = vcmp.ge.f32.partialorder %v1025_v49, 0.0  ;;  %v1119_v51 = vmul.f32 0.01, %v1025_v49  ;;  %v1907_v52 = vpop.f32.mrb[10].mxu0 }
 0x2a0   : > { %v1040_v53 = vadd.f32 %v1907_v52, %v2279_v41  ;;  %v1034_v54 = vpop.f32.mrb[11].mxu0  ;;  %v1136_v57 = vsel %vm1104_vm6, %v1030_v47, %v1120_v50  ;;  %v2337_v47 = vld [vmem:[%s2458_s8] ss:$0 sm:$0xff] }
 0x2a1   : > { %v1035_v55 = vadd.f32 %v2279_v41, %v1034_v54  ;;  %v1135_v56 = vsel %vm1103_vm7, %v1025_v49, %v1119_v51 }
 0x2a2   : > { %v1122_v58 = vmul.f32 0.01, %v1040_v53  ;;  %1934 = vmatprep.mubr.msk.f32.mxu1 %vm655_vm3, %v1135_v56  ;;  %1966 = vmatprep.mubr.msk.f32.mxu0 %vm655_vm3, %v1135_v56  ;;  %vm1106_vm8 = vcmp.ge.f32.partialorder %v1040_v53, 0.0 }
 0x2a3   : > { %vm1105_vm9 = vcmp.ge.f32.partialorder %v1035_v55, 0.0  ;;  %v1121_v59 = vmul.f32 0.01, %v1035_v55  ;;  %v1910_v60 = vpop.f32.mrb[12].mxu0  ;;  %1935 = vmatmul.mubr.msk.f32.vlgmr.msra.gmra.mrb[24].mxu1 %vm655_vm3, %v1136_v57  ;;  %1967 = vmatmul.mubr.msk.f32.vlgmr.msra.gmra.mrb[24].mxu0 %vm655_vm3, %v1136_v57 }
 0x2a4   : > { %v1050_v61 = vadd.f32 %v1910_v60, %v2279_v41  ;;  %v1044_v62 = vpop.f32.mrb[13].mxu0  ;;  %v1138_v2 = vsel %vm1106_vm8, %v1040_v53, %v1122_v58 }
 0x2a5   : > { %v1045_v63 = vadd.f32 %v2279_v41, %v1044_v62  ;;  %v1137_v0 = vsel %vm1105_vm9, %v1035_v55, %v1121_v59 }
 0x2a6   : > { %v1124_v1 = vmul.f32 0.01, %v1050_v61  ;;  %1937 = vmatprep.mubr.msk.f32.mxu1 %vm655_vm3, %v1137_v0  ;;  %1969 = vmatprep.mubr.msk.f32.mxu0 %vm655_vm3, %v1137_v0  ;;  %vm1108_vm10 = vcmp.ge.f32.partialorder %v1050_v61, 0.0 }
 0x2a7   : > { %vm1107_vm11 = vcmp.ge.f32.partialorder %v1045_v63, 0.0  ;;  %v1123_v3 = vmul.f32 0.01, %v1045_v63  ;;  %v1913_v4 = vpop.f32.mrb[14].mxu0  ;;  %1938 = vmatmul.mubr.msk.f32.gmra.mrb[26].mxu1 %vm655_vm3, %v1138_v2  ;;  %1970 = vmatmul.mubr.msk.f32.gmra.mrb[26].mxu0 %vm655_vm3, %v1138_v2 }
 0x2a8   : > { %v1060_v5 = vadd.f32 %v1913_v4, %v2279_v41  ;;  %v1054_v6 = vpop.f32.mrb[15].mxu0  ;;  %v1140_v10 = vsel %vm1108_vm10, %v1050_v61, %v1124_v1 }
 0x2a9   : > { %v1055_v7 = vadd.f32 %v2279_v41, %v1054_v6  ;;  %v1139_v8 = vsel %vm1107_vm11, %v1045_v63, %v1123_v3 }
 0x2aa   : > { %v1126_v9 = vmul.f32 0.01, %v1060_v5  ;;  %1940 = vmatprep.mubr.msk.f32.mxu1 %vm655_vm3, %v1139_v8  ;;  %1972 = vmatprep.mubr.msk.f32.mxu0 %vm655_vm3, %v1139_v8  ;;  %vm1110_vm12 = vcmp.ge.f32.partialorder %v1060_v5, 0.0 }
 0x2ab   : > { %vm1109_vm13 = vcmp.ge.f32.partialorder %v1055_v7, 0.0  ;;  %v1125_v11 = vmul.f32 0.01, %v1055_v7  ;;  %v1916_v12 = vpop.f32.mrb[16].mxu0  ;;  %1941 = vmatmul.mubr.msk.f32.gmra.mrb[28].mxu1 %vm655_vm3, %v1140_v10  ;;  %1973 = vmatmul.mubr.msk.f32.gmra.mrb[28].mxu0 %vm655_vm3, %v1140_v10 }
 0x2ac   : > { %v1070_v13 = vadd.f32 %v1916_v12, %v2279_v41  ;;  %v1064_v14 = vpop.f32.mrb[17].mxu0  ;;  %v1142_v18 = vsel %vm1110_vm12, %v1060_v5, %v1126_v9 }
 0x2ad   : > { %v1065_v15 = vadd.f32 %v2279_v41, %v1064_v14  ;;  %v1141_v16 = vsel %vm1109_vm13, %v1055_v7, %v1125_v11 }
 0x2ae   : > { %v1128_v17 = vmul.f32 0.01, %v1070_v13  ;;  %1943 = vmatprep.mubr.msk.f32.mxu1 %vm655_vm3, %v1141_v16  ;;  %1975 = vmatprep.mubr.msk.f32.mxu0 %vm655_vm3, %v1141_v16  ;;  %vm1112_vm14 = vcmp.ge.f32.partialorder %v1070_v13, 0.0 }
 0x2af   : > { %vm1111_vm15 = vcmp.ge.f32.partialorder %v1065_v15, 0.0  ;;  %v1127_v19 = vmul.f32 0.01, %v1065_v15  ;;  %v1919_v20 = vpop.f32.mrb[18].mxu0  ;;  %1944 = vmatmul.mubr.msk.f32.gmra.mrb[30].mxu1 %vm655_vm3, %v1142_v18  ;;  %1976 = vmatmul.mubr.msk.f32.gmra.mrb[30].mxu0 %vm655_vm3, %v1142_v18 }
 0x2b0   : > { %v1080_v21 = vadd.f32 %v1919_v20, %v2279_v41  ;;  %v1074_v22 = vpop.f32.mrb[19].mxu0  ;;  %v1144_v26 = vsel %vm1112_vm14, %v1070_v13, %v1128_v17 }
 0x2b1   : > { %v1075_v23 = vadd.f32 %v2279_v41, %v1074_v22  ;;  %v1143_v24 = vsel %vm1111_vm15, %v1065_v15, %v1127_v19 }
 0x2b2   : > { %v1130_v25 = vmul.f32 0.01, %v1080_v21  ;;  %1946 = vmatprep.mubr.msk.f32.mxu1 %vm655_vm3, %v1143_v24  ;;  %1978 = vmatprep.mubr.msk.f32.mxu0 %vm655_vm3, %v1143_v24  ;;  %vm1114_vm1 = vcmp.ge.f32.partialorder %v1080_v21, 0.0 }
 0x2b3   : > { %vm1113_vm2 = vcmp.ge.f32.partialorder %v1075_v23, 0.0  ;;  %v1129_v27 = vmul.f32 0.01, %v1075_v23  ;;  %v1922_v28 = vpop.f32.mrb[20].mxu0  ;;  %1947 = vmatmul.mubr.msk.f32.gmra.mrb[32].mxu1 %vm655_vm3, %v1144_v26  ;;  %1979 = vmatmul.mubr.msk.f32.gmra.mrb[32].mxu0 %vm655_vm3, %v1144_v26 }
 0x2b4   : > { %v1090_v29 = vadd.f32 %v1922_v28, %v2279_v41  ;;  %v1084_v30 = vpop.f32.mrb[21].mxu0  ;;  %v1146_v34 = vsel %vm1114_vm1, %v1080_v21, %v1130_v25 }
 0x2b5   : > { %v1085_v32 = vadd.f32 %v2279_v41, %v1084_v30  ;;  %v1145_v31 = vsel %vm1113_vm2, %v1075_v23, %v1129_v27 }
 0x2b6   : > { %v1132_v33 = vmul.f32 0.01, %v1090_v29  ;;  %1949 = vmatprep.mubr.msk.f32.mxu1 %vm655_vm3, %v1145_v31  ;;  %1981 = vmatprep.mubr.msk.f32.mxu0 %vm655_vm3, %v1145_v31  ;;  %vm1116_vm4 = vcmp.ge.f32.partialorder %v1090_v29, 0.0 }
 0x2b7   : > { %vm1115_vm5 = vcmp.ge.f32.partialorder %v1085_v32, 0.0  ;;  %v1131_v35 = vmul.f32 0.01, %v1085_v32  ;;  %v1925_v36 = vpop.f32.mrb[22].mxu0  ;;  %1950 = vmatmul.mubr.msk.f32.gmra.mrb[34].mxu1 %vm655_vm3, %v1146_v34  ;;  %1982 = vmatmul.mubr.msk.f32.gmra.mrb[34].mxu0 %vm655_vm3, %v1146_v34 }
 0x2b8   : > { %v1100_v37 = vadd.f32 %v1925_v36, %v2279_v41  ;;  %v1094_v38 = vpop.f32.mrb[23].mxu0  ;;  %v1148_v43 = vsel %vm1116_vm4, %v1090_v29, %v1132_v33 }
 0x2b9   : > { %v1095_v39 = vadd.f32 %v2279_v41, %v1094_v38  ;;  %v1147_v40 = vsel %vm1115_vm5, %v1085_v32, %v1131_v35 }
 0x2ba   : > { %v1134_v42 = vmul.f32 0.01, %v1100_v37  ;;  %1952 = vmatprep.mubr.msk.f32.mxu1 %vm655_vm3, %v1147_v40  ;;  %1984 = vmatprep.mubr.msk.f32.mxu0 %vm655_vm3, %v1147_v40  ;;  %vm1118_vm6 = vcmp.ge.f32.partialorder %v1100_v37, 0.0 }
 0x2bb   : > { %vm1117_vm7 = vcmp.ge.f32.partialorder %v1095_v39, 0.0  ;;  %v1133_v44 = vmul.f32 0.01, %v1095_v39  ;;  %1953 = vmatmul.mubr.msk.f32.gmra.mrb[36].mxu1 %vm655_vm3, %v1148_v43  ;;  %1985 = vmatmul.mubr.msk.f32.gmra.mrb[36].mxu0 %vm655_vm3, %v1148_v43 }
 0x2bc   : > { %v1150_v41 = vsel %vm1118_vm6, %v1100_v37, %v1134_v42 }
 0x2bd   : > { %v1149_v45 = vsel %vm1117_vm7, %v1095_v39, %v1133_v44 }
 0x2be   : > { %1955 = vmatprep.mubr.msk.f32.mxu1 %vm655_vm3, %v1149_v45  ;;  %1987 = vmatprep.mubr.msk.f32.mxu0 %vm655_vm3, %v1149_v45 }
 0x2bf   : > { %1956 = vmatmul.mubr.msk.f32.gmra.mrb[38].mxu1 %vm655_vm3, %v1150_v41  ;;  %1988 = vmatmul.mubr.msk.f32.gmra.mrb[38].mxu0 %vm655_vm3, %v1150_v41 }
 0x376   : > { %v1936_v48 = vpop.f32.mrb[24].mxu1  ;;  %v1968_v49 = vpop.f32.mrb[24].mxu0 }
 0x377   : > { %v1282_v50 = vadd.f32 %v1936_v48, %v2332_v46  ;;  %v1454_v51 = vadd.f32 %v1968_v49, %v2337_v47  ;;  %v1276_v52 = vpop.f32.mrb[25].mxu1  ;;  %v1448_v53 = vpop.f32.mrb[25].mxu0 }
 0x378   : > { %v1277_v54 = vadd.f32 %v2332_v46, %v1276_v52  ;;  %v1449_v55 = vadd.f32 %v2337_v47, %v1448_v53 }
 0x379   : > { %1356 = vst.msk [vmem:[%s2343_s12 + $0x8] sm:$0xff] %vm402_vm0, %v1282_v50  ;;  %1528 = vst.msk [vmem:[%s2349_s16 + $0x8] sm:$0xff] %vm402_vm0, %v1454_v51 }
 0x37a   : > { %1355 = vst.msk [vmem:[%s2343_s12] sm:$0xff] %vm402_vm0, %v1277_v54  ;;  %1527 = vst.msk [vmem:[%s2349_s16] sm:$0xff] %vm402_vm0, %v1449_v55  ;;  %v1939_v56 = vpop.f32.mrb[26].mxu1  ;;  %v1971_v57 = vpop.f32.mrb[26].mxu0 }
 0x37b   : > { %v1292_v58 = vadd.f32 %v1939_v56, %v2332_v46  ;;  %v1464_v59 = vadd.f32 %v1971_v57, %v2337_v47  ;;  %v1286_v60 = vpop.f32.mrb[27].mxu1  ;;  %v1458_v61 = vpop.f32.mrb[27].mxu0 }
 0x37c   : > { %v1287_v62 = vadd.f32 %v2332_v46, %v1286_v60  ;;  %v1459_v63 = vadd.f32 %v2337_v47, %v1458_v61 }
 0x37d   : > { %1358 = vst.msk [vmem:[%s2343_s12 + $0x18] sm:$0xff] %vm402_vm0, %v1292_v58  ;;  %1530 = vst.msk [vmem:[%s2349_s16 + $0x18] sm:$0xff] %vm402_vm0, %v1464_v59 }
 0x37e   : > { %1357 = vst.msk [vmem:[%s2343_s12 + $0x10] sm:$0xff] %vm402_vm0, %v1287_v62  ;;  %1529 = vst.msk [vmem:[%s2349_s16 + $0x10] sm:$0xff] %vm402_vm0, %v1459_v63  ;;  %v1942_v0 = vpop.f32.mrb[28].mxu1  ;;  %v1974_v1 = vpop.f32.mrb[28].mxu0 }
 0x37f   : > { %v1302_v2 = vadd.f32 %v1942_v0, %v2332_v46  ;;  %v1474_v3 = vadd.f32 %v1974_v1, %v2337_v47  ;;  %v1296_v4 = vpop.f32.mrb[29].mxu1  ;;  %v1468_v5 = vpop.f32.mrb[29].mxu0 }
 0x380   : > { %v1297_v6 = vadd.f32 %v2332_v46, %v1296_v4  ;;  %v1469_v7 = vadd.f32 %v2337_v47, %v1468_v5 }
 0x381   : > { %1360 = vst.msk [vmem:[%s2343_s12 + $0x28] sm:$0xff] %vm402_vm0, %v1302_v2  ;;  %1532 = vst.msk [vmem:[%s2349_s16 + $0x28] sm:$0xff] %vm402_vm0, %v1474_v3 }
 0x382   : > { %1359 = vst.msk [vmem:[%s2343_s12 + $0x20] sm:$0xff] %vm402_vm0, %v1297_v6  ;;  %1531 = vst.msk [vmem:[%s2349_s16 + $0x20] sm:$0xff] %vm402_vm0, %v1469_v7  ;;  %v1945_v8 = vpop.f32.mrb[30].mxu1  ;;  %v1977_v9 = vpop.f32.mrb[30].mxu0 }
 0x383   : > { %v1312_v10 = vadd.f32 %v1945_v8, %v2332_v46  ;;  %v1484_v11 = vadd.f32 %v1977_v9, %v2337_v47  ;;  %v1306_v12 = vpop.f32.mrb[31].mxu1  ;;  %v1478_v13 = vpop.f32.mrb[31].mxu0 }
 0x384   : > { %v1307_v14 = vadd.f32 %v2332_v46, %v1306_v12  ;;  %v1479_v15 = vadd.f32 %v2337_v47, %v1478_v13 }
 0x385   : > { %1362 = vst.msk [vmem:[%s2343_s12 + $0x38] sm:$0xff] %vm402_vm0, %v1312_v10  ;;  %1534 = vst.msk [vmem:[%s2349_s16 + $0x38] sm:$0xff] %vm402_vm0, %v1484_v11 }
 0x386   : > { %1361 = vst.msk [vmem:[%s2343_s12 + $0x30] sm:$0xff] %vm402_vm0, %v1307_v14  ;;  %1533 = vst.msk [vmem:[%s2349_s16 + $0x30] sm:$0xff] %vm402_vm0, %v1479_v15  ;;  %v1948_v16 = vpop.f32.mrb[32].mxu1  ;;  %v1980_v17 = vpop.f32.mrb[32].mxu0 }
 0x387   : > { %v1322_v18 = vadd.f32 %v1948_v16, %v2332_v46  ;;  %v1494_v19 = vadd.f32 %v1980_v17, %v2337_v47  ;;  %v1316_v20 = vpop.f32.mrb[33].mxu1  ;;  %v1488_v21 = vpop.f32.mrb[33].mxu0 }
 0x388   : > { %v1317_v22 = vadd.f32 %v2332_v46, %v1316_v20  ;;  %v1489_v23 = vadd.f32 %v2337_v47, %v1488_v21 }
 0x389   : > { %1364 = vst.msk [vmem:[%s2343_s12 + $0x48] sm:$0xff] %vm402_vm0, %v1322_v18  ;;  %1536 = vst.msk [vmem:[%s2349_s16 + $0x48] sm:$0xff] %vm402_vm0, %v1494_v19 }
 0x38a   : > { %1363 = vst.msk [vmem:[%s2343_s12 + $0x40] sm:$0xff] %vm402_vm0, %v1317_v22  ;;  %1535 = vst.msk [vmem:[%s2349_s16 + $0x40] sm:$0xff] %vm402_vm0, %v1489_v23  ;;  %v1951_v24 = vpop.f32.mrb[34].mxu1  ;;  %v1983_v25 = vpop.f32.mrb[34].mxu0 }
 0x38b   : > { %v1332_v26 = vadd.f32 %v1951_v24, %v2332_v46  ;;  %v1504_v27 = vadd.f32 %v1983_v25, %v2337_v47  ;;  %v1326_v28 = vpop.f32.mrb[35].mxu1  ;;  %v1498_v29 = vpop.f32.mrb[35].mxu0 }
 0x38c   : > { %v1327_v30 = vadd.f32 %v2332_v46, %v1326_v28  ;;  %v1499_v32 = vadd.f32 %v2337_v47, %v1498_v29 }
 0x38d   : > { %1366 = vst.msk [vmem:[%s2343_s12 + $0x58] sm:$0xff] %vm402_vm0, %v1332_v26  ;;  %1538 = vst.msk [vmem:[%s2349_s16 + $0x58] sm:$0xff] %vm402_vm0, %v1504_v27 }
 0x38e   : > { %1365 = vst.msk [vmem:[%s2343_s12 + $0x50] sm:$0xff] %vm402_vm0, %v1327_v30  ;;  %1537 = vst.msk [vmem:[%s2349_s16 + $0x50] sm:$0xff] %vm402_vm0, %v1499_v32  ;;  %v1954_v31 = vpop.f32.mrb[36].mxu1  ;;  %v1986_v33 = vpop.f32.mrb[36].mxu0 }
 0x38f   : > { %v1342_v34 = vadd.f32 %v1954_v31, %v2332_v46  ;;  %v1514_v35 = vadd.f32 %v1986_v33, %v2337_v47  ;;  %v1336_v36 = vpop.f32.mrb[37].mxu1  ;;  %v1508_v37 = vpop.f32.mrb[37].mxu0 }
 0x390   : > { %v1337_v38 = vadd.f32 %v2332_v46, %v1336_v36  ;;  %v1509_v39 = vadd.f32 %v2337_v47, %v1508_v37 }
 0x391   : > { %1368 = vst.msk [vmem:[%s2343_s12 + $0x68] sm:$0xff] %vm402_vm0, %v1342_v34  ;;  %1540 = vst.msk [vmem:[%s2349_s16 + $0x68] sm:$0xff] %vm402_vm0, %v1514_v35 }
 0x392   : > { %1367 = vst.msk [vmem:[%s2343_s12 + $0x60] sm:$0xff] %vm402_vm0, %v1337_v38  ;;  %1539 = vst.msk [vmem:[%s2349_s16 + $0x60] sm:$0xff] %vm402_vm0, %v1509_v39  ;;  %v1957_v40 = vpop.f32.mrb[38].mxu1  ;;  %v1989_v42 = vpop.f32.mrb[38].mxu0 }
 0x393   : > { %v1352_v43 = vadd.f32 %v1957_v40, %v2332_v46  ;;  %v1524_v44 = vadd.f32 %v1989_v42, %v2337_v47  ;;  %v1346_v45 = vpop.f32.mrb[39].mxu1  ;;  %v1518_v41 = vpop.f32.mrb[39].mxu0 }
 0x394   : > { %v1347_v48 = vadd.f32 %v2332_v46, %v1346_v45  ;;  %v1519_v49 = vadd.f32 %v2337_v47, %v1518_v41 }
 0x395   : > { %1370 = vst.msk [vmem:[%s2343_s12 + $0x78] sm:$0xff] %vm402_vm0, %v1352_v43  ;;  %1542 = vst.msk [vmem:[%s2349_s16 + $0x78] sm:$0xff] %vm402_vm0, %v1524_v44 }
 0x396   : > { %1369 = vst.msk [vmem:[%s2343_s12 + $0x70] sm:$0xff] %vm402_vm0, %v1347_v48  ;;  %1541 = vst.msk [vmem:[%s2349_s16 + $0x70] sm:$0xff] %vm402_vm0, %v1519_v49 }
 0x397 PF: > { %s21_s13 = sadd.s32 1, %s2042_s13  }
 0x398   : > { %p18_p4 = scmp.ge.s32.totalorder %s21_s13, 4  }
 0x39a   :  { %20 = sbr.rel (!%p18_p4) target bundleno = 1 (0x1), region = 100 }

</bundles_post_ra>
